<compile_context>
chip_gen: v7x
topology: tpu7x:2x2x1
jax: 0.10.0
libtpu: 0.0.40
codegen_flags: <defaults>
</compile_context>

<pallas_src>
import functools
import math

import jax
import jax.numpy as jnp
from jax.experimental import pallas as pl
from jax.experimental.pallas import tpu as pltpu


def _sin_time_enc_kernel(t_ref, freq_ref, off_ref, out_ref, *, pack_r, feat_dim):
    """One grid step: out = sin(time_broadcast * freq + offset).

    t_ref   : (blk, 1)  unpacked, or (blk, pack_r) lane-packed
    freq_ref: (1, W)    per-output-column frequency (0 at odd-D pad column)
    off_ref : (1, W)    per-output-column phase offset (0 for sin, pi/2 for cos)
    out_ref : (blk, W)
    """
    freq = freq_ref[...]                                   # (1, W)
    off = off_ref[...]                                     # (1, W)
    if pack_r == 1:
        t_b = t_ref[...]                                   # (blk, 1) -> bcast
    else:
        # Lane-packed: each output row holds pack_r time steps, each spanning
        # feat_dim lanes.  Broadcast time across its feat_dim lanes with a
        # small matmul on the (idle) MXU: scatter[q, l] = 1 iff l in q-th span.
        t = t_ref[...]                                     # (blk, pack_r)
        w = freq.shape[1]
        row_i = jax.lax.broadcasted_iota(jnp.int32, (pack_r, w), 0)
        lane_i = jax.lax.broadcasted_iota(jnp.int32, (pack_r, w), 1)
        lo = row_i * feat_dim
        scatter = jnp.logical_and(lane_i >= lo, lane_i < lo + feat_dim)
        t_b = jnp.dot(t, scatter.astype(jnp.float32),
                      preferred_element_type=jnp.float32)  # (blk, W)
    # One transcendental per element, one full-width lane-dense store.
    out_ref[...] = jnp.sin(t_b * freq + off)


def _pick_block_rows(total_rows, in_width, out_width):
    """D-aware row-block size (accounts for 128-lane VMEM padding)."""
    pad = lambda w: ((max(w, 1) + 127) // 128) * 128
    per_row_bytes = (pad(in_width) + pad(out_width)) * 4
    # ~4 MiB per buffered step -> <= ~8-10 MiB double-buffered (fits v5e's
    # 16 MiB scoped default and v7x's 32 MiB default without raising limits).
    cap = max(8, ((4 << 20) // per_row_bytes) // 8 * 8)
    if total_rows <= 8:
        return total_rows
    if total_rows <= cap:
        # Split into 2 blocks when there is >= ~1 MiB of work so the parallel
        # batch axis can shard across v7x's two TensorCores.
        half_rows = ((total_rows + 15) // 16) * 8
        if total_rows * per_row_bytes >= (1 << 20) and half_rows < total_rows:
            return half_rows
        return total_rows
    return cap


def sinusoidal_time_encoding(time_step, time_encoding_dim, *, block_rows=None):
    """time_step: (B,) int/float array -> (B, time_encoding_dim) float32."""
    D = time_encoding_dim
    assert D >= 2, "time_encoding_dim must be >= 2"
    B = time_step.shape[0]
    half = D // 2
    odd = (D % 2 == 1)

    # Per-output-column frequency and phase offset (cos(x) = sin(x + pi/2)).
    # Odd-D pad column gets freq=0, offset=0 -> sin(0) = 0.
    k = jnp.arange(half, dtype=jnp.float32)
    base_freq = 10.0 ** (k * jnp.float32(-2.0 / half))
    pad_f = [jnp.zeros((1,), jnp.float32)] if odd else []
    freq_row = jnp.concatenate([base_freq, base_freq] + pad_f)        # (D,)
    off_row = jnp.concatenate(
        [jnp.zeros((half,), jnp.float32),
         jnp.full((half,), math.pi / 2.0, jnp.float32)] + pad_f)      # (D,)

    # Lane packing: present output as (B/r, r*D) with r*D a multiple of 128 so
    # every store is a full unmasked vst (row-major view of (B, D)).
    r = 1
    if D % 128 != 0:
        cand = math.lcm(D, 128) // D
        if cand > 1 and B % cand == 0:
            r = cand
    W = r * D
    rows = B // r

    t = time_step.astype(jnp.float32).reshape(rows, r)
    freq_in = jnp.tile(freq_row, r).reshape(1, W)
    off_in = jnp.tile(off_row, r).reshape(1, W)

    if block_rows is None:
        block_rows = _pick_block_rows(rows, r, W)
    else:
        block_rows = min(block_rows, rows)
        if block_rows < rows:
            assert block_rows % 8 == 0, "block_rows must be a multiple of 8"
    grid = (pl.cdiv(rows, block_rows),)

    kernel = functools.partial(_sin_time_enc_kernel, pack_r=r, feat_dim=D)

    out_packed = pl.pallas_call(
        kernel,
        out_shape=jax.ShapeDtypeStruct((rows, W), jnp.float32),
        grid=grid,
        in_specs=[
            pl.BlockSpec((block_rows, r), lambda i: (i, 0)),   # time
            pl.BlockSpec((1, W), lambda i: (0, 0)),            # freq row
            pl.BlockSpec((1, W), lambda i: (0, 0)),            # offset row
        ],
        out_specs=pl.BlockSpec((block_rows, W), lambda i: (i, 0)),
        compiler_params=pltpu.CompilerParams(
            dimension_semantics=("parallel",)),
    )(t, freq_in, off_in)
    return out_packed.reshape(B, D)


def sinusoidal_time_encoding_ref(time_step, time_encoding_dim):
    """Pure-JAX mirror of the PyTorch module, for correctness checking."""
    half = time_encoding_dim // 2
    freqs = 10.0 ** (jnp.arange(half, dtype=jnp.float32) * (-2.0 / half))
    scaled = time_step.astype(jnp.float32)[:, None] * freqs
    sin_enc = jnp.sin(scaled)
    cos_enc = jnp.cos(scaled)
    if time_encoding_dim % 2 == 0:
        return jnp.concatenate([sin_enc, cos_enc], axis=-1)
    zero_pad = jnp.zeros_like(cos_enc[:, :1])
    return jnp.concatenate([sin_enc, cos_enc, zero_pad], axis=-1)


if __name__ == "__main__":
    key = jax.random.PRNGKey(0)

    # (batch, D, explicit block_rows) cases:
    #   (8, 16, None): lane-packed path (r=8, packed width 128), single block.
    #   (8,  9, None): odd D, unpacked path with trailing zero-pad column.
    #   (40, 9, 16)  : multi-block grid (3 steps) with a partial last block.
    cases = [(8, 16, None), (8, 9, None), (40, 9, 16)]
    for batch, D, blk in cases:
        k_case = jax.random.fold_in(key, batch * 131 + D)
        time_step = jax.random.uniform(k_case, (batch,), jnp.float32, 0.0, 10.0)
        out = sinusoidal_time_encoding(time_step, D, block_rows=blk)
        jax.block_until_ready(out)
        ref = sinusoidal_time_encoding_ref(time_step, D)
        assert out.shape == (batch, D), (out.shape, batch, D)
        assert jnp.allclose(out, ref, atol=1e-4, rtol=1e-5), f"mismatch B={batch} D={D}"

    print("KERNEL_OK")
</pallas_src>

<mosaic_0001>
module attributes {stable_mosaic.version = 11 : i64} {
  func.func @_sin_time_enc_kernel(%arg0: i32, %arg1: memref<1x8xf32, #tpu.memory_space<vmem>>, %arg2: memref<1x128xf32, #tpu.memory_space<vmem>>, %arg3: memref<1x128xf32, #tpu.memory_space<vmem>>, %arg4: memref<1x128xf32, #tpu.memory_space<vmem>>) attributes {dimension_semantics = [#tpu.dimension_semantics<parallel>], iteration_bounds = array<i64: 1>, scalar_prefetch = 0 : i64, scratch_operands = 0 : i64, tpu.core_type = #tpu.core_type<tc>, window_params = [{transform_indices = @transform_0, window_bounds = array<i64: 1, 8>}, {pipeline_mode = #tpu.pipeline_mode<synchronous>, transform_indices = @transform_1, window_bounds = array<i64: 1, 128>}, {pipeline_mode = #tpu.pipeline_mode<synchronous>, transform_indices = @transform_2, window_bounds = array<i64: 1, 128>}, {transform_indices = @transform_3, window_bounds = array<i64: 1, 128>}]} {
    %c0 = arith.constant 0 : index
    %c0_0 = arith.constant 0 : index
    %0 = vector.load %arg2[%c0, %c0_0] : memref<1x128xf32, #tpu.memory_space<vmem>>, vector<1x128xf32>
    %c0_1 = arith.constant 0 : index
    %c0_2 = arith.constant 0 : index
    %1 = vector.load %arg3[%c0_1, %c0_2] : memref<1x128xf32, #tpu.memory_space<vmem>>, vector<1x128xf32>
    %c0_3 = arith.constant 0 : index
    %c0_4 = arith.constant 0 : index
    %2 = vector.load %arg1[%c0_3, %c0_4] : memref<1x8xf32, #tpu.memory_space<vmem>>, vector<1x8xf32>
    %3 = tpu.iota {dimensions = array<i32: 0>} : vector<8x128xi32>
    %4 = tpu.iota {dimensions = array<i32: 1>} : vector<8x128xi32>
    %c16_i32 = arith.constant 16 : i32
    %5 = vector.broadcast %c16_i32 : i32 to vector<8x128xi32>
    %6 = arith.muli %3, %5 : vector<8x128xi32>
    %7 = arith.cmpi sge, %4, %6 : vector<8x128xi32>
    %c16_i32_5 = arith.constant 16 : i32
    %8 = vector.broadcast %c16_i32_5 : i32 to vector<8x128xi32>
    %9 = arith.addi %6, %8 : vector<8x128xi32>
    %10 = arith.cmpi slt, %4, %9 : vector<8x128xi32>
    %11 = arith.andi %7, %10 : vector<8x128xi1>
    %12 = arith.extui %11 : vector<8x128xi1> to vector<8x128xi32>
    %13 = arith.sitofp %12 : vector<8x128xi32> to vector<8x128xf32>
    %cst = arith.constant dense<0.000000e+00> : vector<1x128xf32>
    %14 = tpu.matmul %2, %13, %cst {dimension_numbers = #tpu.dot_dimension_numbers<[1], [0], [0], [1], [0, 0, 1, 1], [], []>} : vector<1x8xf32>, vector<8x128xf32>, vector<1x128xf32> -> vector<1x128xf32>
    %15 = arith.mulf %14, %0 : vector<1x128xf32>
    %16 = arith.addf %15, %1 : vector<1x128xf32>
    %17 = math.sin %16 : vector<1x128xf32>
    %c0_6 = arith.constant 0 : index
    %c0_7 = arith.constant 0 : index
    %18 = vector.load %arg4[%c0_6, %c0_7] : memref<1x128xf32, #tpu.memory_space<vmem>>, vector<1x128xf32>
    tpu.vector_store %arg4[%c0_6, %c0_7], %17 {strides = array<i32>} : memref<1x128xf32, #tpu.memory_space<vmem>>, vector<1x128xf32>,
    return
  }
  func.func @transform_0(%arg0: i32) -> (i32, i32) {
    %c0_i32 = arith.constant 0 : i32
    %c0_i32_0 = arith.constant 0 : i32
    return %arg0, %c0_i32 : i32, i32
  }
  func.func @transform_1(%arg0: i32) -> (i32, i32) {
    %c0_i32 = arith.constant 0 : i32
    %c0_i32_0 = arith.constant 0 : i32
    %c0_i32_1 = arith.constant 0 : i32
    return %c0_i32, %c0_i32_0 : i32, i32
  }
  func.func @transform_2(%arg0: i32) -> (i32, i32) {
    %c0_i32 = arith.constant 0 : i32
    %c0_i32_0 = arith.constant 0 : i32
    %c0_i32_1 = arith.constant 0 : i32
    return %c0_i32, %c0_i32_0 : i32, i32
  }
  func.func @transform_3(%arg0: i32) -> (i32, i32) {
    %c0_i32 = arith.constant 0 : i32
    %c0_i32_0 = arith.constant 0 : i32
    return %arg0, %c0_i32 : i32, i32
  }
}

</mosaic_0001>

<bundles_post_ra>
// kernel: tpu_custom_call.1
= control target key start
LH: loop header
LB: loop body
LE: loop exit
PB: predicated region body
PF: predicated region fallthrough
CT: control target
= control target key end

     0   :  { %8 = vsyncpa [#allocation3], 0  ;;  %s400_s0 = inlined_call_operand.hbm [shape: f32[1,8], index: 0, kind: input, shape index: {}]   ;;  %s401_s1 = inlined_call_operand.vmem [shape: f32[1,128], index: 1, kind: input, shape index: {}]   ;;  %s402_s2 = inlined_call_operand.vmem [shape: f32[1,128], index: 2, kind: input, shape index: {}]   ;;  %s403_s3 = inlined_call_operand.hbm [shape: f32[1,128], index: 3, kind: output, shape index: {}]  }
   0x1   :  { %9 = vsyncpa [#allocation4], 0  ;;  %s318_s12 = smov [#allocation2]   ;;  %s270_s16 = scalar_lea.hbm %s400_s0, 16 }
   0x2   :  { %s16_s13 = sshll.u32 %s318_s12, 4  ;;  %p271_p0 = scmp.ne.s32.totalorder %s400_s0, %s270_s16  ;;  %s17_s13 = int_to_ptr.vmem [resolvable:$true] %s16_s13 }
   0x3   :  { %p274_p1 = scmp.lt.u32.totalorder %s270_s16, %s400_s0 }
   0x5   :  { %p276_p2 = pnand %p274_p1, %p271_p0 }
   0x7   :  { %279 = shalt.err (!%p276_p2)
}
   0x8   :  { %s280_s21 = scalar_lea.vmem %s17_s13, 16  ;;  %s284_s22 = scalar_lea.vmem %s17_s13, 32 }
   0x9   :  { %p281_p3 = scmp.ne.s32.totalorder %s17_s13, %s280_s21  ;;  %p285_p4 = scmp.lt.s32.totalorder %s17_s13, %s17_s13 }
   0xa   :  { %p286_p5 = scmp.lt.s32.totalorder %s284_s22, %s280_s21 }
   0xc   :  { %p287_p6 = por %p286_p5, %p285_p4 }
   0xe   :  { %p288_p7 = pnand %p287_p6, %p281_p3 }
  0x10   :  { %291 = shalt.err (!%p288_p7)
}
  0x11   :  { %19 = dma.hbm_to_vmem [thread:$0]  %s400_s0, 16, %s17_s13, [#allocation3]  }
  0x12   :  { %314 = dma.done.wait [#allocation3], 16  }
  0x13   :  { %315 = vsyncadd [#allocation3], 4294967280  ;;  %v30_v0 = vlaneseq  ;;  %v319_v1 = vmov 0.0   ;;  %vm320_vm0 = vmmov 0   ;;  %v29_v6 = vld [vmem:[#allocation2] sm:$0x1] }
  0x14   :  { %246 = vmatprep.subr.mxu0 %v319_v1  ;;  %248 = vmatprep.mubr.msk.f32.mxu0 %vm320_vm0, %v319_v1  ;;  %vm41_vm3 = vcmask 64512   ;;  %v321_v7 = vmov 1.0   ;;  %v27_v8 = vld [vmem:[%s401_s1] sm:$0x1]  ;;  %v322_v25 = vmov 2102212464  }
  0x15   :  { %v31_v2 = vshrl.u32 %v30_v0, 7  ;;  %v33_v3 = vand.u32 127, %v30_v0  ;;  %v28_v9 = vld [vmem:[%s402_s2] sm:$0x1]  ;;  %v323_v27 = vmov 920167782  }
  0x16   :  { %v324_v31 = vmov 1326507024   ;;  %v325_v33 = vmov 683565275   ;;  %v326_v35 = vmov 2475754826  }
  0x17   :  { %v34_v4 = vmul.u32 16, %v31_v2  ;;  %v327_v38 = vmov 2131351028   ;;  %s328_s1 = smov [#allocation5]  }
  0x18   :  { %s228_s2 = sshll.u32 %s328_s1, 4  ;;  %s229_s2 = int_to_ptr.vmem [resolvable:$true] %s228_s2 }
  0x19   :  { %vm35_vm1 = vcmp.ge.s32.totalorder %v33_v3, %v34_v4  ;;  %v36_v5 = vadd.s32 16, %v34_v4  ;;  %s292_s28 = scalar_lea.vmem %s229_s2, 16  ;;  %s296_s29 = scalar_lea.vmem %s229_s2, 32 }
  0x1a   :  { %p293_p8 = scmp.ne.s32.totalorder %s229_s2, %s292_s28  ;;  %p297_p9 = scmp.lt.s32.totalorder %s229_s2, %s229_s2 }
  0x1b   :  { %vm37_vm2 = vcmp.lt.s32.totalorder %v33_v3, %v36_v5  ;;  %p298_p10 = scmp.lt.s32.totalorder %s296_s29, %s292_s28 }
  0x1c   :  { %vm38_vm4 = vmand %vm35_vm1, %vm37_vm2 }
  0x1d   :  { %247 = vmatpush3.msk.msra.mxu0 %vm38_vm4, %v321_v7  ;;  %p299_p11 = por %p298_p10, %p297_p9 }
  0x1e   :  { %249 = vmatmul.mubr.msk.f32.vlgmr.msra.gmra.mrb[0].mxu0 %vm41_vm3, %v29_v6 }
  0x1f   :  { %p300_p12 = pnand %p299_p11, %p293_p8 }
  0xf1   :  { %v111_v10 = vpop.f32.mrb[0].mxu0 }
  0xf2   :  { %v115_v11 = vmul.f32 %v111_v10, %v27_v8  ;;  %v250_v12 = vpop.f32.mrb[1].mxu0 }
  0xf4   :  { %v367_v13 = vadd.f32 %v115_v11, %v28_v9 }
  0xf6   :  { %v120_v14 = vand.u32 2139095040, %v367_v13  ;;  %v117_v15 = vand.u32 2147483647, %v367_v13  ;;  %vm119_vm12 = vcmp.lt.s32.totalorder %v367_v13, 0  ;;  %vm209_vm1 = vweird.f32 %v367_v13 }
  0xf8   :  { %v121_v16 = vshrl.u32 %v120_v14, 23  ;;  %v124_v18 = vand.u32 8388607, %v117_v15  ;;  %vm118_vm13 = vcmp.le.f32.partialorder %v117_v15, 0.7853982 }
  0xfa   :  { %v240_v17 = vadd.s32 4294967169, %v121_v16  ;;  %v125_v21 = vor.u32 8388608, %v124_v18 }
  0xfc   :  { %v127_v19 = vadd.s32 1, %v240_v17  ;;  %v165_v29 = vshll.u32 %v125_v21, 8 }
  0xfe   :  { %vm128_vm5 = vcmp.gt.s32.totalorder %v127_v19, 0 }
  0xff   :  { %v129_v20 = vsel %vm128_vm5, %v127_v19, 0 }
 0x100   :  { %v131_v22 = vand.u32 31, %v129_v20  ;;  %v130_v23 = vshrl.u32 %v129_v20, 5 }
 0x102   :  { %v132_v24 = vsub.s32 32, %v131_v22  ;;  %v143_v26 = vshll.u32 %v322_v25, %v131_v22  ;;  %v146_v28 = vshll.u32 %v323_v27, %v131_v22  ;;  %v134_v34 = vshll.u32 %v325_v33, %v131_v22 }
 0x103   :  { %v137_v37 = vshll.u32 %v326_v35, %v131_v22  ;;  %v140_v40 = vshll.u32 %v327_v38, %v131_v22  ;;  %vm152_vm6 = vcmp.lt.s32.totalorder %v130_v23, 4  ;;  %vm149_vm7 = vcmp.lt.s32.totalorder %v130_v23, 1 }
 0x104   :  { %v144_v30 = vshrl.u32 %v323_v27, %v132_v24  ;;  %v147_v32 = vshrl.u32 %v324_v31, %v132_v24  ;;  %v135_v36 = vshrl.u32 %v326_v35, %v132_v24  ;;  %v138_v39 = vshrl.u32 %v327_v38, %v132_v24 }
 0x105   :  { %v141_v41 = vshrl.u32 %v322_v25, %v132_v24  ;;  %v133_v45 = vshrl.u32 %v325_v33, %v132_v24  ;;  %vm150_vm8 = vcmp.lt.s32.totalorder %v130_v23, 2  ;;  %vm151_vm9 = vcmp.lt.s32.totalorder %v130_v23, 3 }
 0x106   :  { %v145_v42 = vor.u32 %v144_v30, %v143_v26  ;;  %v148_v43 = vor.u32 %v147_v32, %v146_v28  ;;  %v136_v44 = vor.u32 %v135_v36, %v134_v34  ;;  %v139_v46 = vor.u32 %v138_v39, %v137_v37 }
 0x107   :  { %v142_v47 = vor.u32 %v141_v41, %v140_v40 }
 0x108   :  { %v158_v48 = vsel %vm152_vm6, %v145_v42, 920167782  ;;  %v162_v49 = vsel %vm152_vm6, %v148_v43, 1326507024  ;;  %v157_v51 = vsel %vm149_vm7, %v136_v44, %v139_v46  ;;  %v153_v54 = vsel %vm149_vm7, %v133_v45, %v136_v44 }
 0x109   :  { %v154_v50 = vsel %vm152_vm6, %v142_v47, 2102212464  ;;  %v159_v52 = vsel %vm151_vm9, %v142_v47, %v158_v48  ;;  %v161_v53 = vsel %vm149_vm7, %v139_v46, %v142_v47  ;;  %v163_v57 = vsel %vm151_vm9, %v145_v42, %v162_v49 }
 0x10a   :  { %v155_v55 = vsel %vm151_vm9, %v139_v46, %v154_v50  ;;  %v160_v56 = vsel %vm150_vm8, %v157_v51, %v159_v52  ;;  %v164_v58 = vsel %vm150_vm8, %v161_v53, %v163_v57 }
 0x10b   :  { %v373_v59 = vmul.u32.u64.low %v165_v29, %v160_v56  ;;  %v374_v60 = vmul.u32.u64.high %v165_v29, %v160_v56, %v373_v59  ;;  %v376_v61 = vmul.u32.u64.low %v165_v29, %v164_v58  ;;  %v377_v62 = vmul.u32.u64.high %v165_v29, %v164_v58, %v376_v61 }
 0x10c   :  { %v156_v63 = vsel %vm150_vm8, %v153_v54, %v155_v55 }
 0x10d   :  { %v175_v0 = vadd.s32 1, %v374_v60  ;;  %v172_v1 = vmul.u32 %v165_v29, %v156_v63  ;;  %vm174_vm10 = vc.u32 %v377_v62, %v373_v59  ;;  %v173_v14 = vadd.s32 %v373_v59, %v377_v62 }
 0x10f   :  { %v176_v2 = vsel %vm174_vm10, %v175_v0, %v374_v60 }
 0x110   :  { %v177_v3 = vadd.s32 %v176_v2, %v172_v1 }
 0x112   :  { %v178_v4 = vadd.s32 536870912, %v177_v3 }
 0x114   :  { %v179_v5 = vshrl.u32 %v178_v4, 30 }
 0x116   :  { %v180_v6 = vshll.u32 %v179_v5, 30  ;;  %v203_v27 = vsub.s32 4, %v179_v5 }
 0x118   :  { %v181_v7 = vsub.s32 %v177_v3, %v180_v6  ;;  %v204_v30 = vsel %vm119_vm12, %v203_v27, %v179_v5 }
 0x119   :  { %v206_v32 = vsel %vm118_vm13, 0, %v204_v30 }
 0x11a   :  { %v183_v8 = vsub.s32 0, %v181_v7  ;;  %v210_v33 = vadd.s32 3, %v206_v32 }
 0x11c   :  { %v241_v9 = vmin.u32 %v183_v8, %v181_v7  ;;  %v211_v34 = vand.u32 3, %v210_v33 }
 0x11e   :  { %v185_v10 = vclz %v241_v9  ;;  %vm216_vm14 = vcmp.eq.s32.totalorder %v211_v34, 2  ;;  %vm213_vm15 = vcmp.eq.s32.totalorder %v211_v34, 0  ;;  %vm212_vm0 = vcmp.lt.s32.totalorder %v211_v34, 2 }
 0x120   :  { %v242_v11 = vadd.s32 4294967294, %v185_v10 }
 0x122   :  { %vm243_vm11 = vcmp.lt.s32.totalorder %v242_v11, 0 }
 0x123   :  { %v188_v12 = vsel %vm243_vm11, 0, %v242_v11 }
 0x124   :  { %v189_v16 = vsub.s32 32, %v188_v12  ;;  %v193_v17 = vsub.s32 4294967266, %v188_v12  ;;  %v190_v18 = vshll.u32 %v181_v7, %v188_v12 }
 0x126   :  { %v191_v19 = vshrl.u32 %v173_v14, %v189_v16  ;;  %v194_v20 = vadd.s32 127, %v193_v17 }
 0x128   :  { %v192_v21 = vor.u32 %v191_v19, %v190_v18  ;;  %v195_v22 = vshll.u32 %v194_v20, 23 }
 0x12a   :  { %v196_v23 = vor.u32 4788187, %v195_v22  ;;  %v199_v25 = vcvt.s32.f32 %v192_v21 }
 0x12c   :  { %v197_v24 = vand.u32 2147483647, %v196_v23 }
 0x12e   :  { %v200_v26 = vmul.f32 %v199_v25, %v197_v24 }
 0x130   :  { %v201_v28 = vxor.u32 2147483648, %v200_v26 }
 0x132   :  { %v202_v29 = vsel %vm119_vm12, %v201_v28, %v200_v26 }
 0x133   :  { %v205_v31 = vsel %vm118_vm13, %v367_v13, %v202_v29 }
 0x134   :  { %266 = vcosq.f32 %v205_v31 }
 0x135   :  { %268 = vsinq.f32 %v205_v31 }
 0x13e   :  { %v267_v35 = vpop.eup %266 }
 0x13f   :  { %v269_v36 = vpop.eup %268  ;;  %v217_v37 = vxor.u32 2147483648, %v267_v35 }
 0x140   :  { %v214_v38 = vxor.u32 2147483648, %v269_v36 }
 0x141   :  { %v218_v39 = vsel %vm216_vm14, %v217_v37, %v269_v36 }
 0x142   :  { %v215_v15 = vsel %vm213_vm15, %v267_v35, %v214_v38 }
 0x143   :  { %v219_v40 = vsel %vm212_vm0, %v215_v15, %v218_v39 }
 0x144   :  { %v220_v41 = vsel %vm209_vm1, nan, %v219_v40 }
 0x145   :  { %221 = vst [vmem:[#allocation5] sm:$0x1] %v220_v41 }
 0x146   :  { %303 = shalt.err (!%p300_p12)
}
 0x147   :  { %s304_s5 = scalar_lea.hbm %s403_s3, 16 }
 0x148   :  { %p305_p13 = scmp.ne.s32.totalorder %s403_s3, %s304_s5  ;;  %p308_p0 = scmp.lt.u32.totalorder %s304_s5, %s403_s3 }
 0x14a   :  { %p310_p1 = pnand %p308_p0, %p305_p13 }
 0x14c   :  { %313 = shalt.err (!%p310_p1)
}
 0x14d   :  { %231 = dma.vmem_to_hbm [thread:$0]  %s229_s2, 16, %s403_s3, [#allocation4]  }
 0x14e   :  { %316 = dma.done.wait [#allocation4], 16  }
 0x14f   :  { %317 = vsyncadd [#allocation4], 4294967280 }
 0x150   :  { %235 = vsyncpa [#allocation3], 1 }
 0x151   :  { %236 = vsyncpa [#allocation4], 1 }

</bundles_post_ra>
